<compile_context>
chip_gen: v7x
topology: tpu7x:2x2x1
jax: 0.10.0
libtpu: 0.0.40
codegen_flags: <defaults>
</compile_context>

<pallas_src>
import math

import jax
import jax.numpy as jnp
from jax.experimental import pallas as pl
from jax.experimental.pallas import tpu as pltpu

_NEG_LARGE = -1e30  # finite "minus infinity" baked into padded logit columns


def _cdiv(a, b):
    return -(-a // b)


def _round_up(x, m):
    return _cdiv(x, m) * m


# --------------------------------------------------------------------------- #
# Kernel
# --------------------------------------------------------------------------- #
def nb_forward_kernel(x_ref, w1_ref, b1_ref, w2_ref, b2_ref, o_ref):
    # fc[0]: Linear(n_in -> n_hidden); bf16 MXU inputs, f32 accumulation.
    h = jnp.dot(x_ref[...], w1_ref[...], preferred_element_type=jnp.float32)
    # bias add + fc[1]: ReLU (f32, VPU)
    h = jnp.maximum(h + b1_ref[...], 0.0)
    # fc[2]: Linear(n_hidden -> n_out); cast intermediate back to bf16 for MXU.
    logits = jnp.dot(h.astype(jnp.bfloat16), w2_ref[...],
                     preferred_element_type=jnp.float32)
    # b2 already carries -1e30 in the padded columns -> they exp() to 0.
    logits = logits + b2_ref[...]
    # Numerically-stable softmax over the last (feature/lane) axis.
    m = jnp.max(logits, axis=-1, keepdims=True)
    e = jnp.exp(logits - m)
    denom = jnp.sum(e, axis=-1, keepdims=True)
    # Exact divide so rows sum to 1 to f32 precision (NB likelihood downstream
    # assumes proper normalization).
    o_ref[...] = (e / denom).astype(o_ref.dtype)


# --------------------------------------------------------------------------- #
# One-time parameter preparation (padding + bf16 cast), hoisted out of forward
# --------------------------------------------------------------------------- #
def prepare_nb_params(w1, b1, w2, b2):
    """Pad / cast the module parameters once; reuse across forward calls."""
    n_in, n_hidden = w1.shape
    n_out = w2.shape[1]
    assert b1.shape == (1, n_hidden)
    assert w2.shape == (n_hidden, n_out)
    assert b2.shape == (1, n_out)

    n_in_p = _round_up(n_in, 16)      # bf16 sublane packing for W1's first dim
    n_hid_p = _round_up(n_hidden, 128)  # lane-dense hidden activations
    n_out_p = _round_up(n_out, 128)     # lane-dense output (>=128: no vst.msk)

    w1p = jnp.zeros((n_in_p, n_hid_p), jnp.bfloat16).at[:n_in, :n_hidden].set(
        w1.astype(jnp.bfloat16))
    b1p = jnp.zeros((1, n_hid_p), jnp.float32).at[:, :n_hidden].set(
        b1.astype(jnp.float32))
    w2p = jnp.zeros((n_hid_p, n_out_p), jnp.bfloat16).at[:n_hidden, :n_out].set(
        w2.astype(jnp.bfloat16))
    # Bake the softmax padding mask into the bias: padded logit columns get
    # -1e30 so exp() underflows to exactly 0 (no in-kernel iota/where needed).
    b2p = jnp.full((1, n_out_p), _NEG_LARGE, jnp.float32).at[:, :n_out].set(
        b2.astype(jnp.float32))

    return dict(w1p=w1p, b1p=b1p, w2p=w2p, b2p=b2p,
                n_in=n_in, n_hidden=n_hidden, n_out=n_out,
                n_in_p=n_in_p, n_hid_p=n_hid_p, n_out_p=n_out_p)


def _vmem_limit_bytes(tb, n_in_p, n_hid_p, n_out_p, out_itemsize):
    weights = (n_in_p * n_hid_p + n_hid_p * n_out_p) * 2   # bf16 W1, W2
    biases = (n_hid_p + n_out_p) * 8 * 4                   # f32, sublane-padded
    acts = tb * n_in_p * 2 + tb * n_out_p * out_itemsize   # x tile in, probs out
    scratch = tb * n_hid_p * 4 + 2 * tb * n_out_p * 4      # h, logits/exp temps
    est = 2 * (weights + biases + acts) + scratch          # 2x: double-buffering
    # Floor at the 32 MiB default scoped limit, cap at v7x's 64 MiB physical.
    return int(min(max(est * 3 // 2, 32 * 1024 * 1024), 64 * 1024 * 1024))


# --------------------------------------------------------------------------- #
# Forward wrapper
# --------------------------------------------------------------------------- #
def nb_module_forward(x, params, *, tb=512, out_dtype=jnp.float32):
    """Fused NB_Module.forward (scaling_type='sum' -> softmax).

    x: (B, n_in) f32 -> (B, n_out) probabilities (rows sum to 1).
    params: output of prepare_nb_params (padded bf16 weights, f32 biases).
    out_dtype: set to jnp.bfloat16 to halve output HBM writeback if downstream
               tolerates it (default keeps f32 to match the torch reference).
    """
    B, n_in = x.shape
    assert n_in == params["n_in"]
    n_in_p, n_hid_p, n_out_p = params["n_in_p"], params["n_hid_p"], params["n_out_p"]
    n_out = params["n_out"]
    w1p, b1p, w2p, b2p = params["w1p"], params["b1p"], params["w2p"], params["b2p"]

    # ---- balanced batch tiling -------------------------------------------- #
    # Choose the number of tiles first: at most `tb` rows per tile, and at
    # least 2 tiles once B >= 256 so both v7x TensorCores get real work.
    # TB is then cdiv(B, n_tiles) rounded up to 8 sublanes -> padding waste is
    # bounded by 7 rows instead of up to TB-1.
    n_tiles = max(_cdiv(B, tb), 2 if B >= 256 else 1)
    TB = _round_up(_cdiv(B, n_tiles), 8)
    B_p = _round_up(B, TB)
    grid_b = B_p // TB

    # Activation padding / bf16 cast (the only per-call host prep).
    if B_p == B and n_in_p == n_in:
        xp = x.astype(jnp.bfloat16)
    else:
        xp = jnp.zeros((B_p, n_in_p), jnp.bfloat16).at[:B, :n_in].set(
            x.astype(jnp.bfloat16))

    out = pl.pallas_call(
        nb_forward_kernel,
        out_shape=jax.ShapeDtypeStruct((B_p, n_out_p), out_dtype),
        grid_spec=pl.GridSpec(
            grid=(grid_b,),
            in_specs=[
                # batch-streamed activation tile
                pl.BlockSpec((TB, n_in_p), lambda i: (i, 0)),
                # weights / biases: constant index -> VMEM-resident across tiles
                pl.BlockSpec((n_in_p, n_hid_p), lambda i: (0, 0)),
                pl.BlockSpec((1, n_hid_p), lambda i: (0, 0)),
                pl.BlockSpec((n_hid_p, n_out_p), lambda i: (0, 0)),
                pl.BlockSpec((1, n_out_p), lambda i: (0, 0)),
            ],
            out_specs=pl.BlockSpec((TB, n_out_p), lambda i: (i, 0)),
        ),
        compiler_params=pltpu.CompilerParams(
            # independent batch tiles -> megacore sharding (v7x: 2 TCs)
            dimension_semantics=("parallel",),
            vmem_limit_bytes=_vmem_limit_bytes(
                TB, n_in_p, n_hid_p, n_out_p, jnp.dtype(out_dtype).itemsize),
        ),
    )(xp, w1p, b1p, w2p, b2p)

    # Strip batch / feature padding.
    return out[:B, :n_out]


# --------------------------------------------------------------------------- #
# Init (mimics torch.nn.Linear defaults) and pure-JAX reference
# --------------------------------------------------------------------------- #
def init_params(key, n_in, n_hidden, n_out, r_init=2):
    k1, k2, k3, k4 = jax.random.split(key, 4)
    lim1 = 1.0 / math.sqrt(n_in)
    lim2 = 1.0 / math.sqrt(n_hidden)
    w1 = jax.random.uniform(k1, (n_in, n_hidden), jnp.float32, -lim1, lim1)
    b1 = jax.random.uniform(k2, (1, n_hidden), jnp.float32, -lim1, lim1)
    w2 = jax.random.uniform(k3, (n_hidden, n_out), jnp.float32, -lim2, lim2)
    b2 = jax.random.uniform(k4, (1, n_out), jnp.float32, -lim2, lim2)
    # NB dispersion parameter (unused in forward; part of the module's state)
    log_r = jnp.full((1, n_out), math.log(r_init - 1), jnp.float32)
    return w1, b1, w2, b2, log_r


def reference_forward(x, w1, b1, w2, b2):
    h = jnp.maximum(x @ w1 + b1, 0.0)
    logits = h @ w2 + b2
    return jax.nn.softmax(logits, axis=-1)


if __name__ == "__main__":
    key = jax.random.PRNGKey(0)
    k_x, k_p, k_x2 = jax.random.split(key, 3)

    # Small demo shapes; n_out deliberately not a multiple of 128 to exercise
    # the lane-padding + baked-bias masking path; n_in not a multiple of 128
    # to exercise the unpadded-lane activation path.
    B, n_in, n_hidden, n_out = 8, 32, 64, 100
    x = jax.random.normal(k_x, (B, n_in), jnp.float32)
    w1, b1, w2, b2, log_r = init_params(k_p, n_in, n_hidden, n_out)

    # One-time parameter prep (hoisted out of the forward path).
    params = prepare_nb_params(w1, b1, w2, b2)

    out = jax.block_until_ready(nb_module_forward(x, params))
    ref = reference_forward(x, w1, b1, w2, b2)
    assert out.shape == (B, n_out)
    # bf16 MXU inputs with f32 accumulation -> small, bounded deviation post-softmax.
    assert jnp.allclose(out, ref, atol=2e-3, rtol=2e-2)
    # Exact divide -> softmax rows sum to 1 to f32 precision.
    assert jnp.allclose(jnp.sum(out, axis=-1), jnp.ones((B,)), atol=1e-3)

    # Second run with a batch large enough to exercise the multi-tile grid
    # (B=300 -> two balanced 152-row tiles, only 4 padded rows).
    B2 = 300
    x2 = jax.random.normal(k_x2, (B2, n_in), jnp.float32)
    out2 = jax.block_until_ready(nb_module_forward(x2, params))
    ref2 = reference_forward(x2, w1, b1, w2, b2)
    assert out2.shape == (B2, n_out)
    assert jnp.allclose(out2, ref2, atol=2e-3, rtol=2e-2)
    assert jnp.allclose(jnp.sum(out2, axis=-1), jnp.ones((B2,)), atol=1e-3)

    print("KERNEL_OK")
</pallas_src>

<mosaic_0001>
module attributes {stable_mosaic.version = 11 : i64} {
  func.func @nb_forward_kernel(%arg0: i32, %arg1: memref<8x32xbf16, #tpu.memory_space<vmem>>, %arg2: memref<32x128xbf16, #tpu.memory_space<vmem>>, %arg3: memref<1x128xf32, #tpu.memory_space<vmem>>, %arg4: memref<128x128xbf16, #tpu.memory_space<vmem>>, %arg5: memref<1x128xf32, #tpu.memory_space<vmem>>, %arg6: memref<8x128xf32, #tpu.memory_space<vmem>>) attributes {dimension_semantics = [#tpu.dimension_semantics<parallel>], iteration_bounds = array<i64: 1>, scalar_prefetch = 0 : i64, scratch_operands = 0 : i64, tpu.core_type = #tpu.core_type<tc>, window_params = [{transform_indices = @transform_0, window_bounds = array<i64: 8, 32>}, {pipeline_mode = #tpu.pipeline_mode<synchronous>, transform_indices = @transform_1, window_bounds = array<i64: 32, 128>}, {pipeline_mode = #tpu.pipeline_mode<synchronous>, transform_indices = @transform_2, window_bounds = array<i64: 1, 128>}, {pipeline_mode = #tpu.pipeline_mode<synchronous>, transform_indices = @transform_3, window_bounds = array<i64: 128, 128>}, {pipeline_mode = #tpu.pipeline_mode<synchronous>, transform_indices = @transform_4, window_bounds = array<i64: 1, 128>}, {transform_indices = @transform_5, window_bounds = array<i64: 8, 128>}]} {
    %c0 = arith.constant 0 : index
    %c0_0 = arith.constant 0 : index
    %0 = vector.load %arg1[%c0, %c0_0] : memref<8x32xbf16, #tpu.memory_space<vmem>>, vector<8x32xbf16>
    %c0_1 = arith.constant 0 : index
    %c0_2 = arith.constant 0 : index
    %1 = vector.load %arg2[%c0_1, %c0_2] : memref<32x128xbf16, #tpu.memory_space<vmem>>, vector<32x128xbf16>
    %cst = arith.constant dense<0.000000e+00> : vector<8x128xf32>
    %2 = tpu.matmul %0, %1, %cst {dimension_numbers = #tpu.dot_dimension_numbers<[1], [0], [0], [1], [0, 0, 1, 1], [], []>} : vector<8x32xbf16>, vector<32x128xbf16>, vector<8x128xf32> -> vector<8x128xf32>
    %c0_3 = arith.constant 0 : index
    %c0_4 = arith.constant 0 : index
    %3 = vector.load %arg3[%c0_3, %c0_4] : memref<1x128xf32, #tpu.memory_space<vmem>>, vector<1x128xf32>
    %4 = vector.broadcast %3 : vector<1x128xf32> to vector<8x128xf32>
    %5 = arith.addf %2, %4 : vector<8x128xf32>
    %cst_5 = arith.constant 0.000000e+00 : f32
    %6 = vector.broadcast %cst_5 : f32 to vector<8x128xf32>
    %7 = arith.maximumf %5, %6 : vector<8x128xf32>
    %8 = arith.truncf %7 : vector<8x128xf32> to vector<8x128xbf16>
    %c0_6 = arith.constant 0 : index
    %c0_7 = arith.constant 0 : index
    %9 = vector.load %arg4[%c0_6, %c0_7] : memref<128x128xbf16, #tpu.memory_space<vmem>>, vector<128x128xbf16>
    %cst_8 = arith.constant dense<0.000000e+00> : vector<8x128xf32>
    %10 = tpu.matmul %8, %9, %cst_8 {dimension_numbers = #tpu.dot_dimension_numbers<[1], [0], [0], [1], [0, 0, 1, 1], [], []>} : vector<8x128xbf16>, vector<128x128xbf16>, vector<8x128xf32> -> vector<8x128xf32>
    %c0_9 = arith.constant 0 : index
    %c0_10 = arith.constant 0 : index
    %11 = vector.load %arg5[%c0_9, %c0_10] : memref<1x128xf32, #tpu.memory_space<vmem>>, vector<1x128xf32>
    %12 = vector.broadcast %11 : vector<1x128xf32> to vector<8x128xf32>
    %13 = arith.addf %10, %12 : vector<8x128xf32>
    %cst_11 = arith.constant dense<0xFF800000> : vector<8xf32>
    %14 = vector.multi_reduction <maximumf>, %13, %cst_11 [1] : vector<8x128xf32> to vector<8xf32>
    %15 = vector.shape_cast %14 : vector<8xf32> to vector<8x1xf32>
    %16 = vector.broadcast %15 : vector<8x1xf32> to vector<8x128xf32>
    %17 = arith.subf %13, %16 : vector<8x128xf32>
    %18 = math.exp %17 : vector<8x128xf32>
    %cst_12 = arith.constant dense<0.000000e+00> : vector<8xf32>
    %19 = vector.multi_reduction <add>, %18, %cst_12 [1] : vector<8x128xf32> to vector<8xf32>
    %20 = vector.shape_cast %19 : vector<8xf32> to vector<8x1xf32>
    %21 = vector.broadcast %20 : vector<8x1xf32> to vector<8x128xf32>
    %22 = arith.divf %18, %21 : vector<8x128xf32>
    %c0_13 = arith.constant 0 : index
    %c0_14 = arith.constant 0 : index
    %23 = vector.load %arg6[%c0_13, %c0_14] : memref<8x128xf32, #tpu.memory_space<vmem>>, vector<8x128xf32>
    tpu.vector_store %arg6[%c0_13, %c0_14], %22 {strides = array<i32>} : memref<8x128xf32, #tpu.memory_space<vmem>>, vector<8x128xf32>,
    return
  }
  func.func @transform_0(%arg0: i32) -> (i32, i32) {
    %c0_i32 = arith.constant 0 : i32
    %c0_i32_0 = arith.constant 0 : i32
    return %arg0, %c0_i32 : i32, i32
  }
  func.func @transform_1(%arg0: i32) -> (i32, i32) {
    %c0_i32 = arith.constant 0 : i32
    %c0_i32_0 = arith.constant 0 : i32
    %c0_i32_1 = arith.constant 0 : i32
    return %c0_i32, %c0_i32_0 : i32, i32
  }
  func.func @transform_2(%arg0: i32) -> (i32, i32) {
    %c0_i32 = arith.constant 0 : i32
    %c0_i32_0 = arith.constant 0 : i32
    %c0_i32_1 = arith.constant 0 : i32
    return %c0_i32, %c0_i32_0 : i32, i32
  }
  func.func @transform_3(%arg0: i32) -> (i32, i32) {
    %c0_i32 = arith.constant 0 : i32
    %c0_i32_0 = arith.constant 0 : i32
    %c0_i32_1 = arith.constant 0 : i32
    return %c0_i32, %c0_i32_0 : i32, i32
  }
  func.func @transform_4(%arg0: i32) -> (i32, i32) {
    %c0_i32 = arith.constant 0 : i32
    %c0_i32_0 = arith.constant 0 : i32
    %c0_i32_1 = arith.constant 0 : i32
    return %c0_i32, %c0_i32_0 : i32, i32
  }
  func.func @transform_5(%arg0: i32) -> (i32, i32) {
    %c0_i32 = arith.constant 0 : i32
    %c0_i32_0 = arith.constant 0 : i32
    return %arg0, %c0_i32 : i32, i32
  }
}

</mosaic_0001>

<bundles_post_ra>
// kernel: tpu_custom_call.1
= control target key start
LH: loop header
LB: loop body
LE: loop exit
PB: predicated region body
PF: predicated region fallthrough
CT: control target
= control target key end

     0   :  { %10 = vsyncpa [#allocation3], 0  ;;  %s535_s0 = inlined_call_operand.hbm [shape: bf16[8,32], index: 0, kind: input, shape index: {}]   ;;  %s536_s1 = inlined_call_operand.hbm [shape: bf16[32,128], index: 1, kind: input, shape index: {}]   ;;  %s537_s2 = inlined_call_operand.vmem [shape: f32[1,128], index: 2, kind: input, shape index: {}]   ;;  %s538_s3 = inlined_call_operand.hbm [shape: bf16[128,128], index: 3, kind: input, shape index: {}]   ;;  %s539_s4 = inlined_call_operand.vmem [shape: f32[1,128], index: 4, kind: input, shape index: {}]   ;;  %s540_s5 = inlined_call_operand.hbm [shape: f32[8,128], index: 5, kind: output, shape index: {}]  }
   0x1   :  { %11 = vsyncpa [#allocation6], 0 }
   0x2   :  { %12 = vsyncpa [#allocation4], 0  ;;  %s437_s18 = smov [#allocation5]   ;;  %s343_s22 = scalar_lea.hbm %s536_s1, 256 }
   0x3   :  { %s28_s19 = sshll.u32 %s437_s18, 4  ;;  %p344_p0 = scmp.ne.s32.totalorder %s536_s1, %s343_s22  ;;  %s29_s19 = int_to_ptr.vmem [resolvable:$true] %s28_s19 }
   0x4   :  { %p347_p1 = scmp.lt.u32.totalorder %s343_s22, %s536_s1 }
   0x6   :  { %p349_p2 = pnand %p347_p1, %p344_p0 }
   0x8   :  { %352 = shalt.err (!%p349_p2)
}
   0x9   :  { %s353_s27 = scalar_lea.vmem %s29_s19, 256  ;;  %p358_p4 = scmp.lt.s32.totalorder %s29_s19, %s29_s19 }
   0xa   :  { %p354_p3 = scmp.ne.s32.totalorder %s29_s19, %s353_s27  ;;  %p359_p5 = scmp.lt.s32.totalorder %s353_s27, %s353_s27 }
   0xc   :  { %p360_p6 = por %p359_p5, %p358_p4 }
   0xe   :  { %p361_p7 = pnand %p360_p6, %p354_p3 }
  0x10   :  { %364 = shalt.err (!%p361_p7)
}
  0x11   :  { %s438_s28 = smov 64   ;;  %s439_s29 = smov 4  }
  0x12   :  { %34 = dma.hbm_to_vmem [thread:$0]  %s536_s1, 256, %s29_s19, [#allocation6], %s438_s28, %s438_s28, %s439_s29  }
  0x13   :  { %s440_s7 = smov [#allocation2]   ;;  %s441_s9 = smov [#allocation7]  }
  0x14   :  { %s19_s8 = sshll.u32 %s440_s7, 4  ;;  %s42_s10 = sshll.u32 %s441_s9, 4  ;;  %s20_s8 = int_to_ptr.vmem [resolvable:$true] %s19_s8  ;;  %s43_s10 = int_to_ptr.vmem [resolvable:$true] %s42_s10 }
  0x15   :  { %s365_s13 = scalar_lea.hbm %s535_s0, 64 }
  0x16   :  { %p366_p8 = scmp.ne.s32.totalorder %s535_s0, %s365_s13  ;;  %p369_p9 = scmp.lt.u32.totalorder %s365_s13, %s535_s0 }
  0x18   :  { %p371_p10 = pnand %p369_p9, %p366_p8 }
  0x1a   :  { %374 = shalt.err (!%p371_p10)
}
  0x1b   :  { %s375_s1 = scalar_lea.vmem %s20_s8, 64  ;;  %p380_p12 = scmp.lt.s32.totalorder %s20_s8, %s20_s8 }
  0x1c   :  { %p376_p11 = scmp.ne.s32.totalorder %s20_s8, %s375_s1  ;;  %p381_p13 = scmp.lt.s32.totalorder %s375_s1, %s375_s1 }
  0x1e   :  { %p382_p0 = por %p381_p13, %p380_p12 }
  0x20   :  { %p383_p1 = pnand %p382_p0, %p376_p11 }
  0x22   :  { %386 = shalt.err (!%p383_p1)
}
  0x23   :  { %22 = dma.hbm_to_vmem [thread:$0]  %s535_s0, 64, %s20_s8, [#allocation3]  }
  0x24   :  { %s387_s22 = scalar_lea.hbm %s538_s3, 1024 }
  0x25   :  { %p388_p2 = scmp.ne.s32.totalorder %s538_s3, %s387_s22  ;;  %p391_p3 = scmp.lt.u32.totalorder %s387_s22, %s538_s3 }
  0x27   :  { %p393_p4 = pnand %p391_p3, %p388_p2 }
  0x29   :  { %396 = shalt.err (!%p393_p4)
}
  0x2a   :  { %s397_s27 = scalar_lea.vmem %s43_s10, 1024  ;;  %p402_p6 = scmp.lt.s32.totalorder %s43_s10, %s43_s10 }
  0x2b   :  { %p398_p5 = scmp.ne.s32.totalorder %s43_s10, %s397_s27  ;;  %p403_p7 = scmp.lt.s32.totalorder %s397_s27, %s397_s27 }
  0x2d   :  { %p404_p8 = por %p403_p7, %p402_p6 }
  0x2f   :  { %p405_p9 = pnand %p404_p8, %p398_p5 }
  0x31   :  { %408 = shalt.err (!%p405_p9)
}
  0x32   :  { %48 = dma.hbm_to_vmem [thread:$0]  %s538_s3, 1024, %s43_s10, [#allocation6], %s438_s28, %s438_s28, %s439_s29  }
  0x33   :  { %431 = dma.done.wait [#allocation3], 64  }
  0x34   :  { %432 = vsyncadd [#allocation3], 4294967232 }
  0x35   :  { %433 = dma.done.wait [#allocation6], 1280  }
  0x36   :  { %434 = vsyncadd [#allocation6], 4294966016  ;;  %v442_v0 = vmov 0.0   ;;  %vm443_vm0 = vmmov 0   ;;  %v329_v1 = vld [vmem:[#allocation5] sm:$0xff]   ;;  %v330_v2 = vld [vmem:[#allocation5 + $0x8] sm:$0xff]  }
  0x37   :  { %293 = vmatprep.subr.bf16.mxu0 %v442_v0  ;;  %297 = vmatprep.mubr.msk.bf16.mxu0 %vm443_vm0, %v442_v0  ;;  %v331_v3 = vld [vmem:[#allocation7] sm:$0xff]   ;;  %vm85_vm1 = vcmask 261120   ;;  %v332_v4 = vld [vmem:[#allocation7 + $0x8] sm:$0xff]   ;;  %v333_v6 = vld [vmem:[#allocation7 + $0x10] sm:$0xff]  }
  0x38   :  { %301 = vmatprep.subr.bf16.mxu1 %v442_v0  ;;  %317 = vmatprep.mubr.msk.bf16.mxu1 %vm443_vm0, %v442_v0  ;;  %v61_v5 = vld [vmem:[#allocation2] sm:$0xf]  ;;  %v334_v7 = vld [vmem:[#allocation7 + $0x18] sm:$0xff]   ;;  %v335_v8 = vld [vmem:[#allocation7 + $0x20] sm:$0xff]  }
  0x39   :  { %294 = vmatpush3.bf16.msra.mxu0 %v329_v1  ;;  %302 = vmatpush3.bf16.msra.mxu1 %v331_v3  ;;  %v336_v9 = vld [vmem:[#allocation7 + $0x28] sm:$0xff]   ;;  %v337_v10 = vld [vmem:[#allocation7 + $0x30] sm:$0xff]   ;;  %v338_v11 = vld [vmem:[#allocation7 + $0x38] sm:$0xff]  }
  0x3a   :  { %295 = vmatprep.subr.bf16.mxu0 %v442_v0  ;;  %303 = vmatprep.subr.bf16.mxu1 %v442_v0  ;;  %v268_v12 = vld [vmem:[%s537_s2] ss:$0 sm:$0xff]  ;;  %s444_s2 = smov [#allocation8]  }
  0x3b   :  { %v272_v20 = vld [vmem:[%s539_s4] ss:$0 sm:$0xff]  ;;  %s258_s7 = sshll.u32 %s444_s2, 4  ;;  %s259_s7 = int_to_ptr.vmem [resolvable:$true] %s258_s7 }
  0x3c   :  { %s409_s4 = scalar_lea.vmem %s259_s7, 128  ;;  %p414_p11 = scmp.lt.s32.totalorder %s259_s7, %s259_s7 }
  0x3d   :  { %296 = vmatpush3.bf16.msra.mxu0 %v330_v2  ;;  %304 = vmatpush3.bf16.msra.mxu1 %v332_v4  ;;  %p410_p10 = scmp.ne.s32.totalorder %s259_s7, %s409_s4  ;;  %p415_p12 = scmp.lt.s32.totalorder %s409_s4, %s409_s4 }
  0x3e   :  { %305 = vmatprep.subr.bf16.mxu1 %v442_v0 }
  0x3f   :  { %p416_p13 = por %p415_p12, %p414_p11 }
  0x40   :  { %298 = vmatmul.mubr.msk.bf16.vlgmr.msra.gmra.mrb[0].mxu0 %vm85_vm1, %v61_v5 }
  0x41   :  { %306 = vmatpush3.bf16.msra.mxu1 %v333_v6  ;;  %p417_p0 = pnand %p416_p13, %p410_p10 }
  0x42   :  { %307 = vmatprep.subr.bf16.mxu1 %v442_v0 }
  0x45   :  { %308 = vmatpush3.bf16.msra.mxu1 %v334_v7 }
  0x46   :  { %309 = vmatprep.subr.bf16.mxu1 %v442_v0 }
  0x49   :  { %310 = vmatpush3.bf16.msra.mxu1 %v335_v8 }
  0x4a   :  { %311 = vmatprep.subr.bf16.mxu1 %v442_v0 }
  0x4d   :  { %312 = vmatpush3.bf16.msra.mxu1 %v336_v9 }
  0x4e   :  { %313 = vmatprep.subr.bf16.mxu1 %v442_v0 }
  0x51   :  { %314 = vmatpush3.bf16.msra.mxu1 %v337_v10 }
  0x52   :  { %315 = vmatprep.subr.bf16.mxu1 %v442_v0 }
  0x55   :  { %316 = vmatpush3.bf16.msra.mxu1 %v338_v11 }
 0x113   :  { %v123_v13 = vpop.f32.mrb[0].mxu0 }
 0x114   :  { %v124_v14 = vadd.f32 %v268_v12, %v123_v13  ;;  %v299_v15 = vpop.f32.mrb[1].mxu0 }
 0x115   :  { %v126_v16 = vpop.f32.mrb[2].mxu0 }
 0x116   :  { %v129_v17 = vmax.f32 %v124_v14, 0.0  ;;  %v300_v18 = vpop.f32.mrb[3].mxu0 }
 0x118   :  { %v130_v19 = vpack.c.bf16 %v129_v17, %v129_v17 }
 0x11a   :  { %318 = vmatmul.mubr.bf16.vlgmr.msra.gmra.mrb[0].mxu1 %v130_v19 }
 0x1ed   :  { %v236_v21 = vpop.f32.mrb[0].mxu1 }
 0x1ee   :  { %v237_v22 = vadd.f32 %v272_v20, %v236_v21  ;;  %v319_v23 = vpop.f32.mrb[1].mxu1 }
 0x1ef   :  { %v239_v24 = vpop.f32.mrb[2].mxu1 }
 0x1f0   :  { %242 = vmax.xlane.f32.xlu0 %v237_v22  ;;  %v320_v25 = vpop.f32.mrb[3].mxu1 }
 0x27d   :  { %v243_v26 = vpop.xlane.xlu0 %242 }
 0x27e   :  { %v244_v27 = vsub.f32 %v237_v22, %v243_v26 }
 0x280   :  { %v245_v28 = vmul.f32 1.442695, %v244_v27 }
 0x282   :  { %339 = vpow2.f32 %v245_v28 }
 0x28c   :  { %v340_v29 = vpop.eup %339 }
 0x28d   :  { %247 = vadd.xlane.f32.xlu0 %v340_v29 }
 0x31a   :  { %v248_v30 = vpop.xlane.xlu0 %247 }
 0x31b   :  { %341 = vrcp.f32 %v248_v30 }
 0x325   :  { %v342_v31 = vpop.eup %341 }
 0x326   :  { %v250_v32 = vmul.f32 %v342_v31, %v340_v29 }
 0x328   :  { %251 = vst [vmem:[#allocation8] sm:$0xff] %v250_v32 }
 0x329   :  { %420 = shalt.err (!%p417_p0)
}
 0x32a   :  { %s421_s10 = scalar_lea.hbm %s540_s5, 128 }
 0x32b   :  { %p422_p1 = scmp.ne.s32.totalorder %s540_s5, %s421_s10  ;;  %p425_p2 = scmp.lt.u32.totalorder %s421_s10, %s540_s5 }
 0x32d   :  { %p427_p3 = pnand %p425_p2, %p422_p1 }
 0x32f   :  { %430 = shalt.err (!%p427_p3)
}
 0x330   :  { %261 = dma.vmem_to_hbm [thread:$0]  %s259_s7, 128, %s540_s5, [#allocation4]  }
 0x331   :  { %435 = dma.done.wait [#allocation4], 128  }
 0x332   :  { %436 = vsyncadd [#allocation4], 4294967168 }
 0x333   :  { %265 = vsyncpa [#allocation3], 1 }
 0x334   :  { %266 = vsyncpa [#allocation6], 1 }
 0x335   :  { %267 = vsyncpa [#allocation4], 1 }

</bundles_post_ra>
